<compile_context>
chip_gen: v5e
topology: v5e:2x2
jax: 0.10.0
libtpu: 0.0.40
codegen_flags: <defaults>
</compile_context>

<pallas_src>
import functools

import jax
import jax.numpy as jnp
from jax.experimental import pallas as pl
from jax.experimental.pallas import tpu as pltpu


# ---------------------------------------------------------------------------
# Propagation kernel: one LightGCN layer  y = A_hat @ x,  acc_out = acc_in + y
# ---------------------------------------------------------------------------
def _propagate_kernel(adj_ref, x_ref, acc_in_ref, y_ref, acc_out_ref, psum_ref):
    k = pl.program_id(1)

    @pl.when(k == 0)
    def _():
        psum_ref[...] = jnp.zeros_like(psum_ref)

    psum_ref[...] += jnp.dot(adj_ref[...], x_ref[...],
                             preferred_element_type=jnp.float32)

    @pl.when(k == pl.num_programs(1) - 1)
    def _():
        y = psum_ref[...]
        y_ref[...] = y.astype(y_ref.dtype)          # bf16 feed for next layer
        acc_out_ref[...] = acc_in_ref[...] + y      # f32 running layer sum


def _propagate_and_accumulate(adj_bf16, x_bf16, acc_f32, *, tm, tk):
    n = adj_bf16.shape[0]
    dp = x_bf16.shape[1]
    flops = 2 * n * n * dp
    bytes_accessed = n * n * 2 + n * dp * (2 + 4 + 2 + 4)
    return pl.pallas_call(
        _propagate_kernel,
        out_shape=(jax.ShapeDtypeStruct((n, dp), jnp.bfloat16),
                   jax.ShapeDtypeStruct((n, dp), jnp.float32)),
        grid_spec=pltpu.PrefetchScalarGridSpec(
            num_scalar_prefetch=0,
            grid=(n // tm, n // tk),
            in_specs=[
                pl.BlockSpec((tm, tk), lambda i, k: (i, k)),   # adj tile
                pl.BlockSpec((tk, dp), lambda i, k: (k, 0)),   # x tile
                pl.BlockSpec((tm, dp), lambda i, k: (i, 0)),   # acc_in
            ],
            out_specs=[
                pl.BlockSpec((tm, dp), lambda i, k: (i, 0)),   # y (bf16)
                pl.BlockSpec((tm, dp), lambda i, k: (i, 0)),   # acc_out (f32)
            ],
            scratch_shapes=[pltpu.VMEM((tm, dp), jnp.float32)],
        ),
        compiler_params=pltpu.CompilerParams(
            dimension_semantics=("parallel", "arbitrary"),
            vmem_limit_bytes=32 * 1024 * 1024,
        ),
        cost_estimate=pl.CostEstimate(flops=flops, transcendentals=0,
                                      bytes_accessed=bytes_accessed),
    )(adj_bf16, x_bf16, acc_f32)


# ---------------------------------------------------------------------------
# Finalize kernel: out = dropout(acc * alpha, p)   (inverted dropout)
# ---------------------------------------------------------------------------
def _finalize_kernel(seed_ref, acc_ref, out_ref, *, p: float, alpha: float):
    tm, dp = out_ref.shape
    acc = acc_ref[...]

    if p <= 0.0:                                   # static branch: no dropout
        out_ref[...] = acc * jnp.float32(alpha)
    elif p >= 1.0:                                 # static branch: drop all
        out_ref[...] = jnp.zeros_like(out_ref)
    else:
        i = pl.program_id(0)
        row = jax.lax.broadcasted_iota(jnp.int32, (tm, dp), 0).astype(jnp.uint32)
        col = jax.lax.broadcasted_iota(jnp.int32, (tm, dp), 1).astype(jnp.uint32)
        base = (i * tm).astype(jnp.uint32)
        gid = (base + row) * jnp.uint32(dp) + col          # global element id
        seed = seed_ref[0].astype(jnp.uint32)
        # murmur3-style integer finalizer (counter-based hash -> uniform bits)
        h = gid * jnp.uint32(0x9E3779B1) + seed * jnp.uint32(0x85EBCA77) \
            + jnp.uint32(0x165667B1)
        h = h ^ (h >> 16)
        h = h * jnp.uint32(0x7FEB352D)
        h = h ^ (h >> 15)
        h = h * jnp.uint32(0x846CA68B)
        h = h ^ (h >> 16)
        # top 24 bits -> uniform float in [0, 1)
        u = (h >> 8).astype(jnp.int32).astype(jnp.float32) * jnp.float32(1.0 / (1 << 24))
        keep = (u >= jnp.float32(p)).astype(jnp.float32)
        coeff = jnp.float32(alpha / (1.0 - p))             # mean + dropout scale fused
        out_ref[...] = acc * keep * coeff


def _finalize(acc_f32, seed, *, p, alpha, tm):
    n, dp = acc_f32.shape
    seed_arr = jnp.asarray([seed], dtype=jnp.int32)
    kernel = functools.partial(_finalize_kernel, p=p, alpha=alpha)
    return pl.pallas_call(
        kernel,
        out_shape=jax.ShapeDtypeStruct((n, dp), jnp.float32),
        grid_spec=pltpu.PrefetchScalarGridSpec(
            num_scalar_prefetch=1,
            grid=(n // tm,),
            in_specs=[pl.BlockSpec((tm, dp), lambda i, seed_ref: (i, 0))],
            out_specs=pl.BlockSpec((tm, dp), lambda i, seed_ref: (i, 0)),
        ),
        compiler_params=pltpu.CompilerParams(
            dimension_semantics=("parallel",),
            vmem_limit_bytes=32 * 1024 * 1024,
        ),
    )(seed_arr, acc_f32)


# ---------------------------------------------------------------------------
# Host-side glue
# ---------------------------------------------------------------------------
def build_normalized_adjacency(edge_index, num_nodes):
    """Dense symmetric-normalized adjacency D^{-1/2} A D^{-1/2} (no self-loops).

    edge_index: (2, E) int32, rows (src, dst); message flows src -> dst,
    i.e. A[dst, src] = 1, matching torch_geometric LGConv propagation.
    """
    src, dst = edge_index[0], edge_index[1]
    adj = jnp.zeros((num_nodes, num_nodes), jnp.float32)
    adj = adj.at[dst, src].set(1.0)
    deg_out = adj.sum(axis=0)
    deg_in = adj.sum(axis=1)
    inv_sqrt_out = jnp.where(deg_out > 0, 1.0 / jnp.sqrt(deg_out), 0.0)
    inv_sqrt_in = jnp.where(deg_in > 0, 1.0 / jnp.sqrt(deg_in), 0.0)
    return inv_sqrt_in[:, None] * adj * inv_sqrt_out[None, :]


def xavier_uniform(key, shape):
    fan_in, fan_out = shape[0], shape[1]
    bound = (6.0 / (fan_in + fan_out)) ** 0.5
    return jax.random.uniform(key, shape, jnp.float32, -bound, bound)


def _round_up(x, m):
    return ((x + m - 1) // m) * m


def lgcn_with_dropout(embedding, edge_index, seed, *, num_layers: int = 3,
                      p: float = 0.1, tm: int = 128, tk: int = 128):
    """embedding: (N, D) f32, edge_index: (2, E) int32, seed: python int."""
    n, d = embedding.shape
    adj = build_normalized_adjacency(edge_index, n)

    # Tile sizes: must divide N, else fall back to full extent.
    tm = tm if (tm <= n and n % tm == 0) else n
    tk = tk if (tk <= n and n % tk == 0) else n

    # Pad embedding dim to a lane-dense multiple of 128 (sliced off at the end).
    dp = _round_up(d, 128)
    x0 = jnp.zeros((n, dp), jnp.float32).at[:, :d].set(embedding)

    adj_bf16 = adj.astype(jnp.bfloat16)          # MXU-native operands
    x = x0.astype(jnp.bfloat16)
    acc = x0                                     # f32 running sum (starts at x_0)

    for _ in range(num_layers):
        x, acc = _propagate_and_accumulate(adj_bf16, x, acc, tm=tm, tk=tk)

    alpha = 1.0 / (num_layers + 1)
    out = _finalize(acc, seed, p=p, alpha=alpha, tm=tm)
    return out[:, :d]


if __name__ == "__main__":
    num_nodes = 256
    embedding_dim = 64
    num_layers = 3
    dropout_p = 0.1
    num_edges = 512

    key = jax.random.PRNGKey(0)
    k_emb, k_src, k_dst = jax.random.split(key, 3)

    # Deterministic parameter init (Embedding(num_nodes, dim) + xavier uniform).
    embedding_weight = xavier_uniform(k_emb, (num_nodes, embedding_dim))

    # Synthetic edge_index (2, E) as the forward() input.
    src = jax.random.randint(k_src, (num_edges,), 0, num_nodes, jnp.int32)
    dst = jax.random.randint(k_dst, (num_edges,), 0, num_nodes, jnp.int32)
    edge_index = jnp.stack([src, dst], axis=0)

    # Run with dropout (train-mode forward).
    out = lgcn_with_dropout(embedding_weight, edge_index, seed=0,
                            num_layers=num_layers, p=dropout_p)
    out = jax.block_until_ready(out)
    assert out.shape == (num_nodes, embedding_dim)
    assert out.dtype == jnp.float32
    assert bool(jnp.all(jnp.isfinite(out)))

    # Sanity check vs. pure-JAX reference with dropout disabled (p=0).
    out_nodrop = jax.block_until_ready(
        lgcn_with_dropout(embedding_weight, edge_index, seed=0,
                          num_layers=num_layers, p=0.0))
    adj_ref = build_normalized_adjacency(edge_index, num_nodes)
    xk = embedding_weight
    ref = embedding_weight / (num_layers + 1)
    for _ in range(num_layers):
        xk = adj_ref @ xk
        ref = ref + xk / (num_layers + 1)
    assert bool(jnp.allclose(out_nodrop, ref, atol=3e-2, rtol=3e-2))

    # Dropout actually dropped a sensible fraction of elements.
    frac_dropped = float(jnp.mean((out == 0.0).astype(jnp.float32)))
    assert 0.01 <= frac_dropped <= 0.3

    print("KERNEL_OK")
</pallas_src>

<mosaic_0001>
module attributes {stable_mosaic.version = 11 : i64} {
  func.func @_propagate_kernel(%arg0: i32, %arg1: i32, %arg2: memref<128x128xbf16, #tpu.memory_space<vmem>>, %arg3: memref<128x128xbf16, #tpu.memory_space<vmem>>, %arg4: memref<128x128xf32, #tpu.memory_space<vmem>>, %arg5: memref<128x128xbf16, #tpu.memory_space<vmem>>, %arg6: memref<128x128xf32, #tpu.memory_space<vmem>>, %arg7: memref<128x128xf32, #tpu.memory_space<vmem>>) attributes {dimension_semantics = [#tpu.dimension_semantics<parallel>, #tpu.dimension_semantics<arbitrary>], iteration_bounds = array<i64: 2, 2>, scalar_prefetch = 0 : i64, scratch_operands = 1 : i64, tpu.core_type = #tpu.core_type<tc>, window_params = [{transform_indices = @transform_0, window_bounds = array<i64: 128, 128>}, {transform_indices = @transform_1, window_bounds = array<i64: 128, 128>}, {transform_indices = @transform_2, window_bounds = array<i64: 128, 128>}, {transform_indices = @transform_3, window_bounds = array<i64: 128, 128>}, {transform_indices = @transform_4, window_bounds = array<i64: 128, 128>}]} {
    %c0_i32 = arith.constant 0 : i32
    %0 = arith.cmpi eq, %arg1, %c0_i32 : i32
    %1 = arith.extui %0 : i1 to i32
    %c0_i32_0 = arith.constant 0 : i32
    %2 = arith.cmpi ne, %1, %c0_i32_0 : i32
    scf.if %2 {
      %cst_9 = arith.constant 0.000000e+00 : f32
      %12 = vector.broadcast %cst_9 : f32 to vector<128x128xf32>
      %c0_10 = arith.constant 0 : index
      %c0_11 = arith.constant 0 : index
      %13 = vector.load %arg7[%c0_10, %c0_11] : memref<128x128xf32, #tpu.memory_space<vmem>>, vector<128x128xf32>
      tpu.vector_store %arg7[%c0_10, %c0_11], %12 {strides = array<i32>} : memref<128x128xf32, #tpu.memory_space<vmem>>, vector<128x128xf32>,
    } else {
    }
    %c0 = arith.constant 0 : index
    %c0_1 = arith.constant 0 : index
    %3 = vector.load %arg7[%c0, %c0_1] : memref<128x128xf32, #tpu.memory_space<vmem>>, vector<128x128xf32>
    %c0_2 = arith.constant 0 : index
    %c0_3 = arith.constant 0 : index
    %4 = vector.load %arg2[%c0_2, %c0_3] : memref<128x128xbf16, #tpu.memory_space<vmem>>, vector<128x128xbf16>
    %c0_4 = arith.constant 0 : index
    %c0_5 = arith.constant 0 : index
    %5 = vector.load %arg3[%c0_4, %c0_5] : memref<128x128xbf16, #tpu.memory_space<vmem>>, vector<128x128xbf16>
    %cst = arith.constant dense<0.000000e+00> : vector<128x128xf32>
    %6 = tpu.matmul %4, %5, %cst {dimension_numbers = #tpu.dot_dimension_numbers<[1], [0], [0], [1], [0, 0, 1, 1], [], []>} : vector<128x128xbf16>, vector<128x128xbf16>, vector<128x128xf32> -> vector<128x128xf32>
    %7 = arith.addf %3, %6 : vector<128x128xf32>
    %c0_6 = arith.constant 0 : index
    %c0_7 = arith.constant 0 : index
    %8 = vector.load %arg7[%c0_6, %c0_7] : memref<128x128xf32, #tpu.memory_space<vmem>>, vector<128x128xf32>
    tpu.vector_store %arg7[%c0_6, %c0_7], %7 {strides = array<i32>} : memref<128x128xf32, #tpu.memory_space<vmem>>, vector<128x128xf32>,
    %c1_i32 = arith.constant 1 : i32
    %9 = arith.cmpi eq, %arg1, %c1_i32 : i32
    %10 = arith.extui %9 : i1 to i32
    %c0_i32_8 = arith.constant 0 : i32
    %11 = arith.cmpi ne, %10, %c0_i32_8 : i32
    scf.if %11 {
      %c0_9 = arith.constant 0 : index
      %c0_10 = arith.constant 0 : index
      %12 = vector.load %arg7[%c0_9, %c0_10] : memref<128x128xf32, #tpu.memory_space<vmem>>, vector<128x128xf32>
      %13 = arith.truncf %12 : vector<128x128xf32> to vector<128x128xbf16>
      %c0_11 = arith.constant 0 : index
      %c0_12 = arith.constant 0 : index
      %14 = vector.load %arg5[%c0_11, %c0_12] : memref<128x128xbf16, #tpu.memory_space<vmem>>, vector<128x128xbf16>
      tpu.vector_store %arg5[%c0_11, %c0_12], %13 {strides = array<i32>} : memref<128x128xbf16, #tpu.memory_space<vmem>>, vector<128x128xbf16>,
      %c0_13 = arith.constant 0 : index
      %c0_14 = arith.constant 0 : index
      %15 = vector.load %arg4[%c0_13, %c0_14] : memref<128x128xf32, #tpu.memory_space<vmem>>, vector<128x128xf32>
      %16 = arith.addf %15, %12 : vector<128x128xf32>
      %c0_15 = arith.constant 0 : index
      %c0_16 = arith.constant 0 : index
      %17 = vector.load %arg6[%c0_15, %c0_16] : memref<128x128xf32, #tpu.memory_space<vmem>>, vector<128x128xf32>
      tpu.vector_store %arg6[%c0_15, %c0_16], %16 {strides = array<i32>} : memref<128x128xf32, #tpu.memory_space<vmem>>, vector<128x128xf32>,
    } else {
    }
    return
  }
  func.func @transform_0(%arg0: i32, %arg1: i32) -> (i32, i32) {
    %c0_i32 = arith.constant 0 : i32
    return %arg0, %arg1 : i32, i32
  }
  func.func @transform_1(%arg0: i32, %arg1: i32) -> (i32, i32) {
    %c0_i32 = arith.constant 0 : i32
    %c0_i32_0 = arith.constant 0 : i32
    return %arg1, %c0_i32 : i32, i32
  }
  func.func @transform_2(%arg0: i32, %arg1: i32) -> (i32, i32) {
    %c0_i32 = arith.constant 0 : i32
    %c0_i32_0 = arith.constant 0 : i32
    return %arg0, %c0_i32 : i32, i32
  }
  func.func @transform_3(%arg0: i32, %arg1: i32) -> (i32, i32) {
    %c0_i32 = arith.constant 0 : i32
    %c0_i32_0 = arith.constant 0 : i32
    return %arg0, %c0_i32 : i32, i32
  }
  func.func @transform_4(%arg0: i32, %arg1: i32) -> (i32, i32) {
    %c0_i32 = arith.constant 0 : i32
    %c0_i32_0 = arith.constant 0 : i32
    return %arg0, %c0_i32 : i32, i32
  }
}

</mosaic_0001>

<bundles_post_ra>
// kernel: tpu_custom_call.1
= control target key start
LH: loop header
LB: loop body
LE: loop exit
PB: predicated region body
PF: predicated region fallthrough
CT: control target
= control target key end

     0   :  { %s1906_s0 = inlined_call_operand.hbm [shape: bf16[256,256], index: 0, kind: input, shape index: {}]   ;;  %s1907_s1 = inlined_call_operand.hbm [shape: bf16[256,128], index: 1, kind: input, shape index: {}]   ;;  %s1908_s2 = inlined_call_operand.hbm [shape: f32[256,128], index: 2, kind: input, shape index: {}]   ;;  %s1909_s3 = inlined_call_operand.hbm [shape: bf16[256,128], index: 3, kind: output, shape index: {0}]   ;;  %s1910_s4 = inlined_call_operand.hbm [shape: f32[256,128], index: 4, kind: output, shape index: {1}]  }
   0x1   :  { %1919 = sst [smem:[#allocation26_spill]] %s1906_s0 }
   0x2   :  { %1920 = sst [smem:[#allocation27_spill]] %s1907_s1 }
   0x3   :  { %1921 = sst [smem:[#allocation28_spill]] %s1908_s2 }
   0x4   :  { %1922 = sst [smem:[#allocation29_spill]] %s1909_s3 }
   0x5   :  { %1923 = sst [smem:[#allocation30_spill]] %s1910_s4 }
   0x6   :  { %10 = vsyncpa [#allocation4], 0 }
   0x7   :  { %12 = vsyncpa [#allocation4 + $0x1], 0 }
   0x8   :  { %13 = vsyncpa [#allocation7], 0 }
   0x9   :  { %15 = vsyncpa [#allocation7 + $0x1], 0 }
   0xa   :  { %16 = vsyncpa [#allocation5], 0 }
   0xb   :  { %18 = vsyncpa [#allocation5 + $0x1], 0 }
   0xc   :  { %19 = vsyncpa [#allocation11], 0 }
   0xd   :  { %21 = vsyncpa [#allocation11 + $0x1], 0  ;;  %s1524_s15 = smov 0   ;;  %s1526_s16 = smov 0  }
   0xe   :  { %s1528_s17 = smov 0   ;;  %s1530_s18 = smov 0  }
   0xf   :  { %s1532_s19 = smov 0   ;;  %s1534_s20 = smov 0  }
  0x10   :  { %s1536_s21 = smov 0   ;;  %s1538_s22 = smov 0  }
  0x11   :  { %s1540_s23 = smov 0   ;;  %s1542_s24 = smov 0  }
  0x12   :  { %s1544_s25 = smov 0   ;;  %s1546_s26 = smov 0  }
  0x13   :  { %s1548_s27 = smov 0   ;;  %s1550_s28 = smov 0  }
  0x14 LB: > { %1924 = sst [smem:[#allocation17_spill]] %s1456_s20  ;;  %s1595_s29 = sadd.s32 4294967295, %s1488_s28   ;;  %s1488_s28 = sphi %s1550_s28, %s27_s28   ;;  %s1484_s27 = sphi %s1548_s27, %s1970_s27   ;;  %s1480_s26 = sphi %s1546_s26, %s1957_s26   ;;  %s1476_s25 = sphi %s1544_s25, %s1969_s25   ;;  %s1472_s24 = sphi %s1542_s24, %s1968_s24   ;;  %s1468_s23 = sphi %s1540_s23, %s1955_s23   ;;  %s1464_s22 = sphi %s1538_s22, %s1967_s22   ;;  %s1460_s21 = sphi %s1536_s21, %s1966_s21   ;;  %s1456_s20 = sphi %s1534_s20, %s1965_s20   ;;  %s1452_s19 = sphi %s1532_s19, %s1964_s19   ;;  %s1448_s18 = sphi %s1530_s18, %s1963_s18   ;;  %s1444_s17 = sphi %s1528_s17, %s1962_s17   ;;  %s1440_s16 = sphi %s1526_s16, %s1961_s16   ;;  %s1436_s15 = sphi %s1524_s15, %s1960_s15  }
  0x15   : > { %1925 = sst [smem:[#allocation18_spill]] %s1468_s23  ;;  %s36_s30 = sadd.s32 1, %s1480_s26 }
  0x16   : > { %1926 = sst [smem:[#allocation19_spill]] %s1472_s24  ;;  %p37_p0 = scmp.ge.s32.totalorder %s36_s30, 2 }
  0x17   : > { %1927 = sst [smem:[#allocation20_spill]] %s1476_s25  ;;  %s39_s5 = sadd.s32 1, %s1484_s27 }
  0x18   : > { %1928 = sst [smem:[#allocation21_spill]] %s1480_s26  ;;  %p56_p1 = scmp.eq.s32.totalorder %s1488_s28, 0 }
  0x19   : > { %p62_p2 = scmp.eq.s32.totalorder %s1595_s29, 0  ;;  %s1972_s30 = smov (%p37_p0, %s36_s30), 0 }
  0x1a   : > { %1929 = sst [smem:[#allocation22_spill]] %s1972_s30  ;;  %s1974_s5 = smov (!%p37_p0, %s39_s5), %s1484_s27 }
  0x1b   : > { %s44_s6 = ssub.s32 %s1480_s26, %s1972_s30  ;;  %s74_s7 = sadd.s32 1, %s1456_s20 }
  0x1c   : > { %p41_p3 = scmp.ge.s32.totalorder %s1974_s5, 2  ;;  %p72_p4 = scmp.eq.s32.totalorder %s44_s6, 0 }
  0x1d   : > { %p81_p5 = scmp.ne.s32.totalorder %s1456_s20, %s1452_s19  ;;  %p87_p6 = scmp.ne.s32.totalorder %s1452_s19, %s1448_s18 }
  0x1e   : > { %s1976_s5 = smov (%p41_p3, %s1974_s5), 0  ;;  %p1089_p11 = scmp.lt.s32.totalorder %s1488_s28, 4 }
  0x1f   : > { %1930 = sst [smem:[#allocation23_spill]] %s1976_s5  ;;  %s1618_s9 = ssub.s32 %s1484_s27, %s1976_s5 }
  0x20   : > { %s1614_s8 = scalar_select %p72_p4, %s1456_s20, %s74_s7  }
  0x21   : > { %p1622_p7 = por %p81_p5, %p56_p1  ;;  %s45_s11 = sor.u32 %s44_s6, %s1618_s9 }
  0x22   : > { %1931 = sst [smem:[#allocation24_spill]] %s1614_s8  ;;  %p1629_p8 = por %p87_p6, %p62_p2 }
  0x23   : > { %p1633_p9 = scmp.eq.s32.totalorder %s45_s11, 0  ;;  %p98_p10 = scmp.eq.s32.totalorder %s1618_s9, 0 }
  0x24   : > { %s213_s14 = sand.u32 1, %s1488_s28   ;;  %s215_s18 = sand.u32 1, %s1456_s20  }
  0x25   : > { %s884_s7 = sshll.u32 %s215_s18, 6  ;;  %s971_s5 = sshll.u32 %s1480_s26, 6 }
  0x26   : > { %s1935_s1 = sld [smem:[#allocation27_spill]]  ;;  %s217_s4 = scalar_lea.vmem [#allocation6], %s884_s7 }
  0x27   : > { %s225_s11 = sshll.u32 %s217_s4, 4  ;;  %p1076_p12 = pnand %p1089_p11, %p1622_p7  ;;  %s226_s11 = int_to_ptr.vmem [resolvable:$true] %s225_s11 }
  0x28   : > { %p890_p13 = scmp.ge.s32.totalorder %s1488_s28, 1  ;;  %p255_p0 = scmp.lt.s32.totalorder %s1488_s28, 5 }
  0x29   : > { %s1651_s30 = scalar_lea.sflag [#allocation7], %s213_s14  ;;  %s1491_s18 = smov 4  }
  0x2a   : > { %p1654_p3 = pnand %p890_p13, %p255_p0  ;;  %p55_p4 = scmp.ne.s32.totalorder %s1468_s23, %s1464_s22 }
  0x2b   : > { %p61_p6 = scmp.ne.s32.totalorder %s1464_s22, %s1460_s21  ;;  %s189_s14 = sand.u32 1, %s1468_s23  }
  0x2c   : > { %s222_s8 = scalar_lea.hbm %s1935_s1, %s971_s5  ;;  %s1490_s5 = smov 64  }
  0x2d   : > { %s223_s3 = sshll.u32 %s222_s8, 4  ;;  %s48_s8 = sadd.s32 1, %s1468_s23  ;;  %s224_s3 = int_to_ptr.hbm [resolvable:$true] %s223_s3 }
  0x2e   : > { %1078 = dma.hbm_to_vmem [thread:$0]  (!%p1076_p12), %s224_s3, 1024, %s226_s11, %s1651_s30, %s1490_s5, %s1490_s5, %s1491_s18  }
  0x2f   : > { %s1664_s10 = scalar_select %p1633_p9, %s1468_s23, %s48_s8  }
  0x30   : > { %p1668_p5 = por %p56_p1, %p55_p4  ;;  %s970_s3 = sshll.u32 %s1484_s27, 5 }
  0x31   : > { %1937 = sst [smem:[#allocation25_spill]] %s1664_s10  ;;  %p1678_p7 = por %p62_p2, %p61_p6 }
  0x32   : > { %s880_s13 = sshll.u32 %s189_s14, 6  ;;  %s198_s11 = sadd.s32 %s1480_s26, %s970_s3 }
  0x33   : > { %s883_s8 = sshll.u32 %s198_s11, 2  ;;  %s1940_s0 = sld [smem:[#allocation26_spill]] }
  0x34   : > { %s193_s23 = scalar_lea.vmem [#allocation3], %s880_s13  ;;  %p1073_p9 = pnand %p1089_p11, %p1668_p5 }
  0x35   : > { %s203_s20 = sshll.u32 %s193_s23, 4  ;;  %s190_s3 = scalar_lea.sflag [#allocation4], %s189_s14  ;;  %s204_s20 = int_to_ptr.vmem [resolvable:$true] %s203_s20 }
  0x36   : > { %s1492_s26 = smov 128   ;;  %s877_s11 = sadd.s32 4294967294, %s1488_s28  }
  0x37   : > { %s100_s24 = sadd.s32 1, %s1444_s17  ;;  %p107_p12 = scmp.ne.s32.totalorder %s1444_s17, %s1440_s16 }
  0x38   : > { %s1695_s1 = scalar_select %p98_p10, %s1444_s17, %s100_s24  }
  0x39   : > { %s200_s10 = scalar_lea.hbm %s1940_s0, %s883_s8  ;;  %p113_p13 = scmp.ne.s32.totalorder %s1440_s16, %s1436_s15 }
  0x3a   : > { %s201_s25 = sshll.u32 %s200_s10, 4  ;;  %p137_p0 = scmp.eq.s32.totalorder %s1595_s29, 3  ;;  %s202_s25 = int_to_ptr.hbm [resolvable:$true] %s201_s25 }
  0x3b   : > { %1075 = dma.hbm_to_vmem [thread:$0]  (!%p1073_p9), %s202_s25, 1024, %s204_s20, %s190_s3, %s1492_s26, %s1490_s5, %s1491_s18  }
  0x3c   : > { %p143_p4 = scmp.eq.s32.totalorder %s877_s11, 3  ;;  %p1704_p6 = por %p107_p12, %p56_p1 }
  0x3d   : > { %p1710_p5 = por %p113_p13, %p62_p2  ;;  %p1714_p9 = por %p137_p0, %p107_p12 }
  0x3e   : > { %p1718_p10 = por %p143_p4, %p113_p13  ;;  %s237_s9 = sand.u32 1, %s1444_s17  }
  0x3f   : > { %s972_s5 = sshll.u32 %s1484_s27, 7  ;;  %s887_s18 = sshll.u32 %s237_s9, 7 }
  0x40   : > { %s1945_s2 = sld [smem:[#allocation28_spill]]  ;;  %s239_s8 = scalar_lea.vmem [#allocation8], %s887_s18 }
  0x41   : > { %s247_s21 = sshll.u32 %s239_s8, 4  ;;  %p1079_p1 = pnand %p1089_p11, %p1704_p6  ;;  %s248_s21 = int_to_ptr.vmem [resolvable:$true] %s247_s21 }
  0x42   : > { %s1493_s3 = smov 8   ;;  %s261_s11 = sand.u32 (!%p1654_p3), 1, %s1464_s22  }
  0x43   : > { %s891_s9 = sshll.u32 (!%p1654_p3), %s261_s11, 6  ;;  %s262_s0 = scalar_lea.sflag (!%p1654_p3), [#allocation4], %s261_s11 }
  0x44   : > { %259 = sbr.rel (%p1654_p3) target bundleno = 377 (0x179), region = 32  ;;  %s1735_s10 = scalar_lea.vmem (!%p1654_p3), [#allocation3], %s891_s9 }
  0x46   : > { %s244_s14 = scalar_lea.hbm %s1945_s2, %s972_s5 }
  0x47   : > { %s245_s13 = sshll.u32 %s244_s14, 4  ;;  %s246_s13 = int_to_ptr.hbm [resolvable:$true] %s245_s13 }
  0x48   : > { %1081 = dma.hbm_to_vmem [thread:$0]  (!%p1079_p1), %s246_s13, 2048, %s248_s21, %s1651_s30, %s1492_s26, %s1492_s26, %s1493_s3  }
  0x49   : > { %1415 = dma.done.wait (%p1678_p7), %s262_s0, 1024  }
  0x4a   : > { %1417 = vsyncadd (%p1678_p7), %s262_s0, 4294966272  ;;  %s271_s23 = sand.u32 1, %s1595_s29   ;;  %s273_s26 = sand.u32 1, %s1452_s19  }
  0x4b   : > { %s892_s30 = sshll.u32 %s273_s26, 6  ;;  %s272_s4 = scalar_lea.sflag [#allocation7], %s271_s23 }
  0x4c   : > { %s1743_s5 = scalar_lea.vmem [#allocation6], %s892_s30 }
  0x4d   : > { %1419 = dma.done.wait (%p1629_p8), %s272_s4, 1024  }
  0x4e   : > { %1421 = vsyncadd (%p1629_p8), %s272_s4, 4294966272  ;;  %s1750_s18 = sand.u32 1, %s1440_s16  }
  0x4f   : > { %s893_s0 = sshll.u32 %s1750_s18, 7 }
  0x50   : > { %s1753_s6 = scalar_lea.vmem [#allocation8], %s893_s0 }
  0x51   : > { %1423 = dma.done.wait (%p1710_p5), %s272_s4, 2048  }
  0x52   : > { %1425 = vsyncadd (%p1710_p5), %s272_s4, 4294965248  ;;  %s894_s29 = sshll.u32 %s1750_s18, 6  ;;  %s1762_s14 = scalar_lea.vmem [#allocation10], %s893_s0 }
  0x53   : > { %s1760_s7 = scalar_lea.vmem [#allocation9], %s894_s29  ;;  %s1946_s12 = sld [smem:[#allocation19_spill]] }
  0x59   : > { %p896_p2 = scmp.ne.s32.totalorder %s1946_s12, 0 }
  0x5b   : > { %334 = sbr.rel (%p896_p2) target bundleno = 113 (0x71), region = 48 }
  0x60   : > { %v1494_v0 = vmov 0.0  }
  0x61   : > { %335 = vst [vmem:[#allocation2 + $0x30] sm:$0xff] %v1494_v0 }
  0x62   : > { %336 = vst [vmem:[#allocation2] sm:$0xff] %v1494_v0 }
  0x63   : > { %337 = vst [vmem:[#allocation2 + $0x58] sm:$0xff] %v1494_v0 }
  0x64   : > { %338 = vst [vmem:[#allocation2 + $0x18] sm:$0xff] %v1494_v0 }
  0x65   : > { %339 = vst [vmem:[#allocation2 + $0x50] sm:$0xff] %v1494_v0 }
  0x66   : > { %340 = vst [vmem:[#allocation2 + $0x68] sm:$0xff] %v1494_v0 }
  0x67   : > { %341 = vst [vmem:[#allocation2 + $0x8] sm:$0xff] %v1494_v0 }
  0x68   : > { %342 = vst [vmem:[#allocation2 + $0x48] sm:$0xff] %v1494_v0 }
  0x69   : > { %343 = vst [vmem:[#allocation2 + $0x40] sm:$0xff] %v1494_v0 }
  0x6a   : > { %344 = vst [vmem:[#allocation2 + $0x20] sm:$0xff] %v1494_v0 }
  0x6b   : > { %345 = vst [vmem:[#allocation2 + $0x10] sm:$0xff] %v1494_v0 }
  0x6c   : > { %346 = vst [vmem:[#allocation2 + $0x38] sm:$0xff] %v1494_v0 }
  0x6d   : > { %347 = vst [vmem:[#allocation2 + $0x60] sm:$0xff] %v1494_v0 }
  0x6e   : > { %348 = vst [vmem:[#allocation2 + $0x70] sm:$0xff] %v1494_v0 }
  0x6f   : > { %349 = vst [vmem:[#allocation2 + $0x78] sm:$0xff] %v1494_v0 }
  0x70   : > { %350 = vst [vmem:[#allocation2 + $0x28] sm:$0xff] %v1494_v0 }
  0x71 PF: > { %v988_v1 = vld [vmem:[%s1743_s5 + $0x38] sm:$0xff]  ;;  %v987_v2 = vld [vmem:[%s1743_s5 + $0x30] sm:$0xff]  ;;  %v986_v3 = vld [vmem:[%s1743_s5 + $0x28] sm:$0xff]  ;;  %s1947_s20 = sld [smem:[#allocation19_spill]] }
  0x72   : > { %495 = vmatpush.bf16.msra.mxu0 %v988_v1  ;;  %1038 = vmatpush.bf16.msra.mxu1 %v988_v1  ;;  %v985_v4 = vld [vmem:[%s1743_s5 + $0x20] sm:$0xff]  ;;  %v984_v5 = vld [vmem:[%s1743_s5 + $0x18] sm:$0xff]  ;;  %v983_v6 = vld [vmem:[%s1743_s5 + $0x10] sm:$0xff] }
  0x73   : > { %1039 = vmatpush.bf16.msra.mxu2 %v988_v1  ;;  %1040 = vmatpush.bf16.msra.mxu3 %v988_v1  ;;  %v982_v7 = vld [vmem:[%s1743_s5 + $0x8] sm:$0xff]  ;;  %v981_v8 = vld [vmem:[%s1743_s5] sm:$0xff]  ;;  %v975_v10 = vld [vmem:[%s1735_s10 + $0x10] sm:$0xff] }
  0x74   : > { %v973_v9 = vld [vmem:[%s1735_s10] sm:$0xff]  ;;  %v979_v12 = vld [vmem:[%s1735_s10 + $0x30] sm:$0xff]  ;;  %v974_v13 = vld [vmem:[%s1735_s10 + $0x8] sm:$0xff] }
  0x75   : > { %v977_v11 = vld [vmem:[%s1735_s10 + $0x20] sm:$0xff]  ;;  %v976_v14 = vld [vmem:[%s1735_s10 + $0x18] sm:$0xff]  ;;  %v978_v15 = vld [vmem:[%s1735_s10 + $0x28] sm:$0xff] }
  0x76   : > { %496 = vmatpush.bf16.msra.mxu0 %v987_v2  ;;  %1041 = vmatpush.bf16.msra.mxu1 %v987_v2  ;;  %v980_v16 = vld [vmem:[%s1735_s10 + $0x38] sm:$0xff]  ;;  %v351_v17 = vld [vmem:[#allocation2 + $0x30] sm:$0xff]  ;;  %v359_v23 = vld [vmem:[#allocation2 + $0x40] sm:$0xff] }
  0x77   : > { %1042 = vmatpush.bf16.msra.mxu2 %v987_v2  ;;  %1043 = vmatpush.bf16.msra.mxu3 %v987_v2  ;;  %v355_v18 = vld [vmem:[#allocation2 + $0x50] sm:$0xff]  ;;  %v363_v24 = vld [vmem:[#allocation2 + $0x60] sm:$0xff]  ;;  %v356_v26 = vld [vmem:[#allocation2 + $0x68] sm:$0xff]  ;;  %p961_p8 = scmp.ne.s32.totalorder %s1947_s20, 1 }
  0x78   : > { %v352_v25 = vld [vmem:[#allocation2] sm:$0xff]  ;;  %v364_v36 = vld [vmem:[#allocation2 + $0x70] sm:$0xff]  ;;  %v353_v37 = vld [vmem:[#allocation2 + $0x58] sm:$0xff] }
  0x79   : > { %v360_v35 = vld [vmem:[#allocation2 + $0x20] sm:$0xff]  ;;  %v357_v38 = vld [vmem:[#allocation2 + $0x8] sm:$0xff]  ;;  %v361_v47 = vld [vmem:[#allocation2 + $0x10] sm:$0xff] }
  0x7a   : > { %497 = vmatpush.bf16.msra.mxu0 %v986_v3  ;;  %1044 = vmatpush.bf16.msra.mxu1 %v986_v3  ;;  %v365_v48 = vld [vmem:[#allocation2 + $0x78] sm:$0xff]  ;;  %v358_v50 = vld [vmem:[#allocation2 + $0x48] sm:$0xff] }
  0x7b   : > { %1045 = vmatpush.bf16.msra.mxu2 %v986_v3  ;;  %1046 = vmatpush.bf16.msra.mxu3 %v986_v3  ;;  %v354_v49 = vld [vmem:[#allocation2 + $0x18] sm:$0xff]  ;;  %v366_v60 = vld [vmem:[#allocation2 + $0x28] sm:$0xff] }
  0x7c   : > { %v362_v59 = vld [vmem:[#allocation2 + $0x38] sm:$0xff] }
  0x7e   : > { %498 = vmatpush.bf16.msra.mxu0 %v985_v4  ;;  %1047 = vmatpush.bf16.msra.mxu1 %v985_v4 }
  0x7f   : > { %1048 = vmatpush.bf16.msra.mxu2 %v985_v4  ;;  %1049 = vmatpush.bf16.msra.mxu3 %v985_v4 }
  0x82   : > { %499 = vmatpush.bf16.msra.mxu0 %v984_v5  ;;  %1050 = vmatpush.bf16.msra.mxu1 %v984_v5 }
  0x83   : > { %1051 = vmatpush.bf16.msra.mxu2 %v984_v5  ;;  %1052 = vmatpush.bf16.msra.mxu3 %v984_v5 }
  0x86   : > { %500 = vmatpush.bf16.msra.mxu0 %v983_v6  ;;  %1053 = vmatpush.bf16.msra.mxu1 %v983_v6 }
  0x87   : > { %1054 = vmatpush.bf16.msra.mxu2 %v983_v6  ;;  %1055 = vmatpush.bf16.msra.mxu3 %v983_v6 }
  0x8a   : > { %501 = vmatpush.bf16.msra.mxu0 %v982_v7  ;;  %1056 = vmatpush.bf16.msra.mxu1 %v982_v7 }
  0x8b   : > { %1057 = vmatpush.bf16.msra.mxu2 %v982_v7  ;;  %1058 = vmatpush.bf16.msra.mxu3 %v982_v7 }
  0x8e   : > { %502 = vmatpush.bf16.msra.mxu0 %v981_v8  ;;  %1059 = vmatpush.bf16.msra.mxu1 %v981_v8 }
  0x8f   : > { %1060 = vmatpush.bf16.msra.mxu2 %v981_v8  ;;  %1061 = vmatpush.bf16.msra.mxu3 %v981_v8 }
  0x91   : > { %503 = vmatmul.bf16.vlgmr.msra.gmra.mxu0 %v973_v9  ;;  %513 = vmatmul.bf16.vlgmr.msra.gmra.mxu1 %v975_v10 }
  0x92   : > { %523 = vmatmul.bf16.vlgmr.msra.gmra.mxu2 %v977_v11  ;;  %533 = vmatmul.bf16.vlgmr.msra.gmra.mxu3 %v979_v12 }
  0xa1   : > { %508 = vmatmul.bf16.gmra.mxu0 %v974_v13  ;;  %518 = vmatmul.bf16.gmra.mxu1 %v976_v14 }
  0xa2   : > { %528 = vmatmul.bf16.gmra.mxu2 %v978_v15  ;;  %538 = vmatmul.bf16.gmra.mxu3 %v980_v16 }
 0x10e   : > { %v504_v19 = vpop.f32.mrf.mxu0  ;;  %v514_v20 = vpop.f32.mrf.mxu1 }
 0x10f   : > { %v544_v21 = vadd.f32 %v504_v19, %v351_v17  ;;  %v548_v22 = vadd.f32 %v514_v20, %v355_v18 }
 0x111   : > { %560 = vst [vmem:[#allocation2 + $0x30] sm:$0xff] %v544_v21 }
 0x112   : > { %564 = vst [vmem:[#allocation2 + $0x50] sm:$0xff] %v548_v22 }
 0x115   : > { %v524_v27 = vpop.f32.mrf.mxu2  ;;  %v534_v28 = vpop.f32.mrf.mxu3 }
 0x116   : > { %v552_v29 = vadd.f32 %v524_v27, %v359_v23  ;;  %v556_v30 = vadd.f32 %v534_v28, %v363_v24  ;;  %v506_v31 = vpop.f32.mrf.mxu0  ;;  %v516_v32 = vpop.f32.mrf.mxu1 }
 0x117   : > { %v545_v33 = vadd.f32 %v506_v31, %v352_v25  ;;  %v549_v34 = vadd.f32 %v516_v32, %v356_v26 }
 0x118   : > { %568 = vst [vmem:[#allocation2 + $0x40] sm:$0xff] %v552_v29 }
 0x119   : > { %572 = vst [vmem:[#allocation2 + $0x60] sm:$0xff] %v556_v30 }
 0x11a   : > { %561 = vst [vmem:[#allocation2] sm:$0xff] %v545_v33 }
 0x11b   : > { %565 = vst [vmem:[#allocation2 + $0x68] sm:$0xff] %v549_v34 }
 0x11d   : > { %v526_v39 = vpop.f32.mrf.mxu2  ;;  %v536_v40 = vpop.f32.mrf.mxu3 }
 0x11e   : > { %v553_v41 = vadd.f32 %v526_v39, %v360_v35  ;;  %v557_v42 = vadd.f32 %v536_v40, %v364_v36  ;;  %v509_v43 = vpop.f32.mrf.mxu0  ;;  %v519_v44 = vpop.f32.mrf.mxu1 }
 0x11f   : > { %v546_v45 = vadd.f32 %v509_v43, %v353_v37  ;;  %v550_v46 = vadd.f32 %v519_v44, %v357_v38 }
 0x120   : > { %569 = vst [vmem:[#allocation2 + $0x20] sm:$0xff] %v553_v41 }
 0x121   : > { %573 = vst [vmem:[#allocation2 + $0x70] sm:$0xff] %v557_v42 }
 0x122   : > { %562 = vst [vmem:[#allocation2 + $0x58] sm:$0xff] %v546_v45 }
 0x123   : > { %566 = vst [vmem:[#allocation2 + $0x8] sm:$0xff] %v550_v46 }
 0x125   : > { %v529_v51 = vpop.f32.mrf.mxu2  ;;  %v539_v52 = vpop.f32.mrf.mxu3 }
 0x126   : > { %v554_v53 = vadd.f32 %v529_v51, %v361_v47  ;;  %v558_v54 = vadd.f32 %v539_v52, %v365_v48  ;;  %v511_v55 = vpop.f32.mrf.mxu0  ;;  %v521_v56 = vpop.f32.mrf.mxu1 }
 0x127   : > { %v547_v57 = vadd.f32 %v511_v55, %v354_v49  ;;  %v551_v58 = vadd.f32 %v521_v56, %v358_v50 }
 0x128   : > { %570 = vst [vmem:[#allocation2 + $0x10] sm:$0xff] %v554_v53 }
 0x129   : > { %574 = vst [vmem:[#allocation2 + $0x78] sm:$0xff] %v558_v54 }
 0x12a   : > { %563 = vst [vmem:[#allocation2 + $0x18] sm:$0xff] %v547_v57 }
 0x12b   : > { %567 = vst [vmem:[#allocation2 + $0x48] sm:$0xff] %v551_v58 }
 0x12d   : > { %v531_v61 = vpop.f32.mrf.mxu2  ;;  %v541_v62 = vpop.f32.mrf.mxu3  ;;  %579 = sbr.rel (%p961_p8) target bundleno = 333 (0x14d), region = 52 }
 0x12e   : > { %v555_v63 = vadd.f32 %v531_v61, %v362_v59  ;;  %v559_v0 = vadd.f32 %v541_v62, %v366_v60 }
 0x130   : > { %571 = vst [vmem:[#allocation2 + $0x38] sm:$0xff] %v555_v63 }
 0x131   : > { %575 = vst [vmem:[#allocation2 + $0x28] sm:$0xff] %v559_v0 }
 0x132   : > { %v580_v1 = vld [vmem:[#allocation2 + $0x30] sm:$0xff]  ;;  %v581_v2 = vld [vmem:[#allocation2] sm:$0xff]  ;;  %v582_v3 = vld [vmem:[#allocation2 + $0x58] sm:$0xff] }
 0x133   : > { %v994_v4 = vpack.c.bf16 %v581_v2, %v580_v1  ;;  %v583_v5 = vld [vmem:[#allocation2 + $0x18] sm:$0xff]  ;;  %v584_v6 = vld [vmem:[#allocation2 + $0x50] sm:$0xff]  ;;  %v585_v7 = vld [vmem:[#allocation2 + $0x68] sm:$0xff] }
 0x134   : > { %v999_v8 = vpack.c.bf16 %v583_v5, %v582_v3  ;;  %v1004_v9 = vpack.c.bf16 %v585_v7, %v584_v6  ;;  %v586_v10 = vld [vmem:[#allocation2 + $0x8] sm:$0xff]  ;;  %v588_v12 = vld [vmem:[#allocation2 + $0x40] sm:$0xff]  ;;  %v590_v15 = vld [vmem:[#allocation2 + $0x10] sm:$0xff] }
 0x135   : > { %v587_v11 = vld [vmem:[#allocation2 + $0x48] sm:$0xff]  ;;  %995 = vst [vmem:[%s1760_s7] sm:$0xff] %v994_v4   ;;  %v589_v14 = vld [vmem:[#allocation2 + $0x20] sm:$0xff]  ;;  %v593_v20 = vld [vmem:[#allocation2 + $0x70] sm:$0xff] }
 0x136   : > { %v1009_v13 = vpack.c.bf16 %v587_v11, %v586_v10  ;;  %1031 = vst [vmem:[%s1760_s7 + $0x8] sm:$0xff] %v999_v8   ;;  %v1014_v17 = vpack.c.bf16 %v589_v14, %v588_v12  ;;  %v592_v19 = vld [vmem:[#allocation2 + $0x60] sm:$0xff]  ;;  %v594_v21 = vld [vmem:[#allocation2 + $0x78] sm:$0xff]  ;;  %v629_v25 = vld [vmem:[%s1753_s6 + $0x8] sm:$0xff] }
 0x137   : > { %v591_v16 = vld [vmem:[#allocation2 + $0x38] sm:$0xff]  ;;  %1032 = vst [vmem:[%s1760_s7 + $0x10] sm:$0xff] %v1004_v9   ;;  %v1024_v22 = vpack.c.bf16 %v593_v20, %v592_v19  ;;  %v628_v24 = vld [vmem:[%s1753_s6] sm:$0xff]  ;;  %v630_v27 = vld [vmem:[%s1753_s6 + $0x10] sm:$0xff]  ;;  %v645_v30 = vadd.f32 %v629_v25, %v581_v2 }
 0x138   : > { %v1019_v18 = vpack.c.bf16 %v591_v16, %v590_v15  ;;  %v595_v23 = vld [vmem:[#allocation2 + $0x28] sm:$0xff]  ;;  %1033 = vst [vmem:[%s1760_s7 + $0x18] sm:$0xff] %v1009_v13   ;;  %v644_v28 = vadd.f32 %v628_v24, %v580_v1  ;;  %v631_v29 = vld [vmem:[%s1753_s6 + $0x18] sm:$0xff]  ;;  %v632_v31 = vld [vmem:[%s1753_s6 + $0x20] sm:$0xff]  ;;  %v646_v32 = vadd.f32 %v630_v27, %v582_v3 }
 0x139   : > { %v1029_v26 = vpack.c.bf16 %v595_v23, %v594_v21  ;;  %1034 = vst [vmem:[%s1760_s7 + $0x20] sm:$0xff] %v1014_v17   ;;  %v633_v33 = vld [vmem:[%s1753_s6 + $0x28] sm:$0xff]  ;;  %v647_v34 = vadd.f32 %v631_v29, %v583_v5  ;;  %v634_v35 = vld [vmem:[%s1753_s6 + $0x30] sm:$0xff]  ;;  %v648_v36 = vadd.f32 %v632_v31, %v584_v6  ;;  %v635_v37 = vld [vmem:[%s1753_s6 + $0x38] sm:$0xff] }
 0x13a   : > { %1035 = vst [vmem:[%s1760_s7 + $0x28] sm:$0xff] %v1019_v18   ;;  %v649_v38 = vadd.f32 %v633_v33, %v585_v7  ;;  %v636_v39 = vld [vmem:[%s1753_s6 + $0x40] sm:$0xff]  ;;  %v650_v40 = vadd.f32 %v634_v35, %v586_v10  ;;  %v637_v41 = vld [vmem:[%s1753_s6 + $0x48] sm:$0xff]  ;;  %v651_v42 = vadd.f32 %v635_v37, %v587_v11  ;;  %v638_v43 = vld [vmem:[%s1753_s6 + $0x50] sm:$0xff] }
 0x13b   : > { %1036 = vst [vmem:[%s1760_s7 + $0x30] sm:$0xff] %v1024_v22   ;;  %v652_v44 = vadd.f32 %v636_v39, %v588_v12  ;;  %v639_v45 = vld [vmem:[%s1753_s6 + $0x58] sm:$0xff]  ;;  %v653_v46 = vadd.f32 %v637_v41, %v589_v14  ;;  %v640_v47 = vld [vmem:[%s1753_s6 + $0x60] sm:$0xff]  ;;  %v654_v48 = vadd.f32 %v638_v43, %v590_v15  ;;  %v641_v49 = vld [vmem:[%s1753_s6 + $0x68] sm:$0xff] }
 0x13c   : > { %1037 = vst [vmem:[%s1760_s7 + $0x38] sm:$0xff] %v1029_v26   ;;  %v655_v50 = vadd.f32 %v639_v45, %v591_v16  ;;  %v642_v51 = vld [vmem:[%s1753_s6 + $0x70] sm:$0xff]  ;;  %v656_v52 = vadd.f32 %v640_v47, %v592_v19  ;;  %v643_v53 = vld [vmem:[%s1753_s6 + $0x78] sm:$0xff]  ;;  %v657_v54 = vadd.f32 %v641_v49, %v593_v20 }
 0x13d   : > { %660 = vst [vmem:[%s1762_s14] sm:$0xff] %v644_v28  ;;  %v658_v55 = vadd.f32 %v642_v51, %v594_v21  ;;  %v659_v56 = vadd.f32 %v643_v53, %v595_v23 }
 0x13e   : > { %661 = vst [vmem:[%s1762_s14 + $0x8] sm:$0xff] %v645_v30 }
 0x13f   : > { %662 = vst [vmem:[%s1762_s14 + $0x10] sm:$0xff] %v646_v32 }
 0x140   : > { %663 = vst [vmem:[%s1762_s14 + $0x18] sm:$0xff] %v647_v34 }
 0x141   : > { %664 = vst [vmem:[%s1762_s14 + $0x20] sm:$0xff] %v648_v36 }
 0x142   : > { %665 = vst [vmem:[%s1762_s14 + $0x28] sm:$0xff] %v649_v38 }
 0x143   : > { %666 = vst [vmem:[%s1762_s14 + $0x30] sm:$0xff] %v650_v40 }
 0x144   : > { %667 = vst [vmem:[%s1762_s14 + $0x38] sm:$0xff] %v651_v42 }
 0x145   : > { %668 = vst [vmem:[%s1762_s14 + $0x40] sm:$0xff] %v652_v44 }
 0x146   : > { %669 = vst [vmem:[%s1762_s14 + $0x48] sm:$0xff] %v653_v46 }
 0x147   : > { %670 = vst [vmem:[%s1762_s14 + $0x50] sm:$0xff] %v654_v48 }
 0x148   : > { %671 = vst [vmem:[%s1762_s14 + $0x58] sm:$0xff] %v655_v50 }
 0x149   : > { %672 = vst [vmem:[%s1762_s14 + $0x60] sm:$0xff] %v656_v52 }
 0x14a   : > { %673 = vst [vmem:[%s1762_s14 + $0x68] sm:$0xff] %v657_v54 }
 0x14b   : > { %674 = vst [vmem:[%s1762_s14 + $0x70] sm:$0xff] %v658_v55 }
 0x14c   : > { %675 = vst [vmem:[%s1762_s14 + $0x78] sm:$0xff] %v659_v56 }
 0x14d PF: > { %s1948_s13 = sld [smem:[#allocation20_spill]]  ;;  %s694_s10 = sshll.u32 %s1760_s7, 4  ;;  %s695_s10 = int_to_ptr.vmem [resolvable:$true] %s694_s10 }
 0x14e   : > { %s1949_s11 = sld [smem:[#allocation29_spill]]  ;;  %s677_s26 = scalar_lea.sflag [#allocation5], %s1750_s18 }
 0x153   : > { %s989_s8 = sshll.u32 %s1948_s13, 6 }
 0x154   : > { %s693_s9 = scalar_lea.hbm %s1949_s11, %s989_s8  ;;  %s1322_s6 = scalar_lea.hbm %s1949_s11, 128 }
 0x155   : > { %s696_s23 = sshll.u32 %s693_s9, 4  ;;  %s697_s23 = int_to_ptr.hbm [resolvable:$true] %s696_s23 }
 0x156   : > { %s1316_s30 = sshra.s32 %s697_s23, 4  ;;  %s1317_s30 = int_to_ptr.hbm [resolvable:$true] %s1316_s30 }
 0x157   : > { %s1318_s4 = scalar_lea.hbm %s1317_s30, 64  ;;  %p1323_p12 = scmp.lt.s32.totalorder %s1317_s30, %s1949_s11 }
 0x158   : > { %p1319_p11 = scmp.ne.s32.totalorder %s1317_s30, %s1318_s4  ;;  %p1324_p13 = scmp.lt.s32.totalorder %s1322_s6, %s1318_s4 }
 0x15a   : > { %p1320_p3 = pnand %p1319_p11, %p1714_p9  ;;  %p1325_p0 = por %p1324_p13, %p1323_p12 }
 0x15c   : > { %p1321_p7 = pneg %p1320_p3 }
 0x15e   : > { %p1326_p4 = pnand %p1325_p0, %p1321_p7 }
 0x160   : > { %1329 = shalt.err (!%p1326_p4)
}
 0x161   : > { %s1495_s7 = smov 64   ;;  %s1496_s20 = smov 4  }
 0x162   : > { %1068 = dma.vmem_to_hbm [thread:$0]  (%p1714_p9), %s695_s10, 1024, %s697_s23, %s677_s26, %s1495_s7, %s1495_s7, %s1496_s20  }
 0x163   : > { %s990_s8 = sshll.u32 %s1948_s13, 7  ;;  %s711_s21 = sshll.u32 %s1762_s14, 4  ;;  %s712_s21 = int_to_ptr.vmem [resolvable:$true] %s711_s21 }
 0x164   : > { %s1950_s5 = sld [smem:[#allocation30_spill]]  ;;  %s682_s4 = scalar_lea.sflag [#allocation11], %s1750_s18 }
 0x16a   : > { %s710_s0 = scalar_lea.hbm %s1950_s5, %s990_s8  ;;  %s1350_s13 = scalar_lea.hbm %s1950_s5, 256 }
 0x16b   : > { %s713_s30 = sshll.u32 %s710_s0, 4  ;;  %s714_s30 = int_to_ptr.hbm [resolvable:$true] %s713_s30 }
 0x16c   : > { %s1344_s6 = sshra.s32 %s714_s30, 4  ;;  %s1345_s6 = int_to_ptr.hbm [resolvable:$true] %s1344_s6 }
 0x16d   : > { %s1346_s29 = scalar_lea.hbm %s1345_s6, 128  ;;  %p1351_p2 = scmp.lt.s32.totalorder %s1345_s6, %s1950_s5 }
 0x16e   : > { %p1347_p6 = scmp.ne.s32.totalorder %s1345_s6, %s1346_s29  ;;  %p1352_p8 = scmp.lt.s32.totalorder %s1350_s13, %s1346_s29 }
 0x170   : > { %p1348_p5 = pnand %p1347_p6, %p1714_p9  ;;  %p1353_p11 = por %p1352_p8, %p1351_p2 }
 0x172   : > { %p1349_p1 = pneg %p1348_p5 }
 0x174   : > { %p1354_p3 = pnand %p1353_p11, %p1349_p1 }
 0x176   : > { %1357 = shalt.err (!%p1354_p3)
}
 0x177   : > { %s1497_s18 = smov 128   ;;  %s1498_s23 = smov 8  }
 0x178   : > { %1069 = dma.vmem_to_hbm [thread:$0]  (%p1714_p9), %s712_s21, 2048, %s714_s30, %s682_s4, %s1497_s18, %s1497_s18, %s1498_s23  }
 0x179 PF: > { %p1090_p7 = scmp.ge.s32.totalorder %s1488_s28, 2  ;;  %s728_s2 = sand.u32 1, %s1436_s15  }
 0x17a   : > { %s729_s26 = scalar_lea.sflag [#allocation5], %s728_s2 }
 0x17b   : > { %p1083_p12 = pnand %p1090_p7, %p1718_p10 }
 0x17d   : > { %p1084_p13 = pneg %p1083_p12 }
 0x17f   : > { %1427 = dma.done.wait (%p1084_p13), %s729_s26, 1024  }
 0x180   : > { %1429 = vsyncadd (%p1084_p13), %s729_s26, 4294966272  ;;  %s739_s7 = scalar_lea.sflag [#allocation11], %s728_s2 }
 0x181   : > { %1431 = dma.done.wait (%p1084_p13), %s739_s7, 2048  }
 0x182   : > { %1433 = vsyncadd (%p1084_p13), %s739_s7, 4294965248  ;;  %s27_s28 = sadd.s32 1, %s1488_s28   ;;  %s1952_s20 = sld [smem:[#allocation17_spill]] }
 0x183   : > { %p1859_p0 = scmp.ge.s32.totalorder %s27_s28, 6   ;;  %s1953_s25 = sld [smem:[#allocation24_spill]] }
 0x184   : > { %s1954_s8 = sld [smem:[#allocation18_spill]]  ;;  %s1960_s15 = smov %s1440_s16 }
 0x185   : > { %s1955_s23 = sld [smem:[#allocation25_spill]]  ;;  %s1961_s16 = smov %s1444_s17 }
 0x186   : > { %s1956_s3 = sld [smem:[#allocation21_spill]]  ;;  %s1962_s17 = smov %s1695_s1 }
 0x187   : > { %s1957_s26 = sld [smem:[#allocation22_spill]]  ;;  %s1963_s18 = smov %s1452_s19 }
 0x188   : > { %s1958_s9 = sld [smem:[#allocation23_spill]]  ;;  %s1964_s19 = smov %s1952_s20 }
 0x189   : > { %s1965_s20 = smov %s1953_s25  ;;  %s1966_s21 = smov %s1464_s22 }
 0x18a   : > { %s1967_s22 = smov %s1954_s8  ;;  %s1969_s25 = smov %s1484_s27 }
 0x18b   :  { %26 = sbr.rel (!%p1859_p0) target bundleno = 20 (0x14), region = 126 }
 0x18c   : > { %s1968_s24 = smov %s1956_s3 }
 0x18e   : > { %s1970_s27 = smov %s1958_s9 }
 0x190   :  { %745 = vsyncpa [#allocation4], 1 }
 0x191   :  { %747 = vsyncpa [#allocation4 + $0x1], 1 }
 0x192   :  { %748 = vsyncpa [#allocation7], 1 }
 0x193   :  { %750 = vsyncpa [#allocation7 + $0x1], 1 }
 0x194   :  { %751 = vsyncpa [#allocation5], 1 }
 0x195   :  { %753 = vsyncpa [#allocation5 + $0x1], 1 }
 0x196   :  { %754 = vsyncpa [#allocation11], 1 }
 0x197   :  { %756 = vsyncpa [#allocation11 + $0x1], 1 }

</bundles_post_ra>
